<compile_context>
chip_gen: v7x
topology: tpu7x:2x2x1
jax: 0.10.0
libtpu: 0.0.40
codegen_flags: <defaults>
</compile_context>

<pallas_src>
import functools
import re

import jax
import jax.numpy as jnp
from jax.experimental import pallas as pl
from jax.experimental.pallas import tpu as pltpu

_LANE = 128
# Candidate slab widths, widest first (multiples of 128).
_WIDTHS = (8192, 4096, 2048, 1024, 512, 256, 128)
_SMALL_TENSOR_BYTES = 4 * 1024 * 1024        # below this, a single block is fine
_VMEM_LIMIT_BYTES = 48 * 1024 * 1024         # 2 x (in+out) x 8 MiB tiles + headroom


def _swish_kernel(beta_ref, x_ref, o_ref, *, compute_dtype):
    """y = x * sigmoid(beta*x) via sigmoid(z) = 0.5*(tanh(z/2)+1).

    One EUP transcendental per element (tanh) instead of exp + divide, so the
    EUP slot never becomes the binding unit; the kernel stays HBM-bound.
    """
    x = x_ref[...].astype(compute_dtype)
    half_beta = (beta_ref[0] * 0.5).astype(compute_dtype)   # SMEM scalar read
    y = x * (0.5 * (jnp.tanh(x * half_beta) + 1.0))
    o_ref[...] = y.astype(o_ref.dtype)


@functools.lru_cache(maxsize=None)
def _tpu_generation():
    try:
        kind = jax.devices()[0].device_kind.lower()
        m = re.search(r"v(\d+)", kind)
        return int(m.group(1)) if m else 0
    except Exception:  # non-TPU / unknown backend: be conservative
        return 0


def _compute_dtype(dtype):
    # bf16 VPU/EUP is native on v6e/v7x; v5e and older must upcast to f32.
    if dtype == jnp.bfloat16 and _tpu_generation() >= 6:
        return jnp.bfloat16
    return jnp.float32


def _pallas_swish_call(x_arr, beta_arr, in_spec, out_spec, grid, out_shape,
                       compute_dtype, donate_input):
    kwargs = {}
    if donate_input:
        # operand 0 is the SMEM beta scalar, operand 1 is the tensor.
        kwargs["input_output_aliases"] = {1: 0}
    return pl.pallas_call(
        functools.partial(_swish_kernel, compute_dtype=compute_dtype),
        out_shape=out_shape,
        grid_spec=pltpu.PrefetchScalarGridSpec(
            num_scalar_prefetch=0,
            grid=grid,
            in_specs=[pl.BlockSpec(memory_space=pltpu.MemorySpace.SMEM), in_spec],
            out_specs=out_spec,
        ),
        compiler_params=pltpu.CompilerParams(
            dimension_semantics=("parallel",),
            vmem_limit_bytes=_VMEM_LIMIT_BYTES,
        ),
        **kwargs,
    )(beta_arr, x_arr)


def swish(x, beta=1.0, *, target_block_bytes=8 * 1024 * 1024, min_grid_steps=4,
          donate_input=False):
    """Apply y = x * sigmoid(beta * x) elementwise via a Pallas TPU kernel."""
    orig_shape = x.shape
    dtype = x.dtype
    if not jnp.issubdtype(dtype, jnp.floating):
        raise TypeError(f"swish kernel supports floating dtypes only, got {dtype}")
    n = x.size
    if n == 0:
        return x

    compute_dtype = _compute_dtype(dtype)
    # beta as an SMEM f32 scalar: works for Python floats and traced arrays alike.
    beta_arr = jnp.asarray(beta, dtype=jnp.float32).reshape(1)
    flat = x.reshape(-1)                       # row-major reshape: no copy
    itemsize = int(jnp.dtype(dtype).itemsize)
    total_bytes = n * itemsize

    lanes = next((w for w in _WIDTHS if n % w == 0), None)

    if lanes is not None:
        # ---- aligned fast path: lane-dense (rows, lanes) slab ----------------
        rows = n // lanes
        x2d = flat.reshape(rows, lanes)
        sublane = max(8, 32 // itemsize)       # 8 f32 / 16 bf16 keeps vregs packed
        bytes_per_row = lanes * itemsize
        br = max(sublane, (target_block_bytes // bytes_per_row) // sublane * sublane)
        # Keep >= min_grid_steps blocks for anything non-tiny so both v7x cores
        # get work and input DMA of block i+1 overlaps compute/store of block i.
        if total_bytes > _SMALL_TENSOR_BYTES and rows >= min_grid_steps * sublane:
            br = min(br, max(sublane, (rows // min_grid_steps) // sublane * sublane))
        if br >= rows:
            br = rows                          # full-extent block (always legal)
        grid = (pl.cdiv(rows, br),)            # Pallas masks the partial last block
        out = _pallas_swish_call(
            x2d, beta_arr,
            in_spec=pl.BlockSpec((br, lanes), lambda i: (i, 0)),
            out_spec=pl.BlockSpec((br, lanes), lambda i: (i, 0)),
            grid=grid,
            out_shape=jax.ShapeDtypeStruct((rows, lanes), dtype),
            compute_dtype=compute_dtype,
            donate_input=donate_input,
        )
        return out.reshape(orig_shape)

    # ---- ragged path: 1-D blocks, masked partial tail (no pad / un-pad pass) --
    gran = 8 * _LANE                           # 1024: full (8,128) vregs per block
    blk = max(gran, (target_block_bytes // itemsize) // gran * gran)
    if total_bytes > _SMALL_TENSOR_BYTES and n >= min_grid_steps * gran:
        blk = min(blk, max(gran, (n // min_grid_steps) // gran * gran))
    if blk >= n:
        blk = n                                # full-extent block (always legal)
    grid = (pl.cdiv(n, blk),)                  # last block masked by Pallas
    out = _pallas_swish_call(
        flat, beta_arr,
        in_spec=pl.BlockSpec((blk,), lambda i: (i,)),
        out_spec=pl.BlockSpec((blk,), lambda i: (i,)),
        grid=grid,
        out_shape=jax.ShapeDtypeStruct((n,), dtype),
        compute_dtype=compute_dtype,
        donate_input=donate_input,
    )
    return out.reshape(orig_shape)


if __name__ == "__main__":
    key = jax.random.PRNGKey(0)
    k1, k2, k3, k4, k5 = jax.random.split(key, 5)

    # 1) NCHW input matching the torch module's typical use (aligned path).
    x1 = jax.random.normal(k1, (2, 4, 16, 16), dtype=jnp.float32)
    y1 = jax.block_until_ready(swish(x1, beta=1.0))
    ref1 = x1 * jax.nn.sigmoid(x1)
    assert y1.shape == x1.shape and y1.dtype == x1.dtype
    assert jnp.allclose(y1, ref1, atol=1e-5, rtol=1e-5)

    # 2) Ragged element count (1-D full-extent path) + beta != 1 branch.
    x2 = jax.random.normal(k2, (3, 5, 7), dtype=jnp.float32)
    y2 = jax.block_until_ready(swish(x2, beta=1.5))
    ref2 = x2 * jax.nn.sigmoid(1.5 * x2)
    assert y2.shape == x2.shape and y2.dtype == x2.dtype
    assert jnp.allclose(y2, ref2, atol=1e-5, rtol=1e-5)

    # 3) 2-D masked partial-last-block path (cdiv grid, rows % block_rows != 0).
    x3 = jax.random.normal(k3, (9, 128), dtype=jnp.float32)
    y3 = jax.block_until_ready(swish(x3, beta=1.0, target_block_bytes=4096))
    ref3 = x3 * jax.nn.sigmoid(x3)
    assert y3.shape == x3.shape and y3.dtype == x3.dtype
    assert jnp.allclose(y3, ref3, atol=1e-5, rtol=1e-5)

    # 4) Ragged + gridded 1-D path (partial last 1-D block, no pad/un-pad).
    x4 = jax.random.normal(k4, (3, 5, 7, 13), dtype=jnp.float32)   # 1365 elements
    y4 = jax.block_until_ready(swish(x4, beta=2.0, target_block_bytes=4096))
    ref4 = x4 * jax.nn.sigmoid(2.0 * x4)
    assert y4.shape == x4.shape and y4.dtype == x4.dtype
    assert jnp.allclose(y4, ref4, atol=1e-5, rtol=1e-5)

    # 5) bfloat16 input (native bf16 compute on v6e/v7x, f32 upcast on older).
    x5 = jax.random.normal(k5, (4, 256), dtype=jnp.float32).astype(jnp.bfloat16)
    y5 = jax.block_until_ready(swish(x5, beta=1.0))
    x5f = x5.astype(jnp.float32)
    ref5 = x5f * jax.nn.sigmoid(x5f)
    assert y5.shape == x5.shape and y5.dtype == x5.dtype
    assert jnp.allclose(y5.astype(jnp.float32), ref5, atol=5e-2, rtol=5e-2)

    print("KERNEL_OK")
</pallas_src>

<mosaic_0001>
module attributes {stable_mosaic.version = 11 : i64} {
  func.func @_swish_kernel(%arg0: i32, %arg1: memref<1xf32, #tpu.memory_space<smem>>, %arg2: memref<1x2048xf32, #tpu.memory_space<vmem>>, %arg3: memref<1x2048xf32, #tpu.memory_space<vmem>>) attributes {dimension_semantics = [#tpu.dimension_semantics<parallel>], iteration_bounds = array<i64: 1>, scalar_prefetch = 0 : i64, scratch_operands = 0 : i64, tpu.core_type = #tpu.core_type<tc>, window_params = [{transform_indices = @transform_0, window_bounds = array<i64: 1>}, {transform_indices = @transform_1, window_bounds = array<i64: 1, 2048>}, {transform_indices = @transform_2, window_bounds = array<i64: 1, 2048>}]} {
    %c0 = arith.constant 0 : index
    %c0_0 = arith.constant 0 : index
    %0 = vector.load %arg2[%c0, %c0_0] : memref<1x2048xf32, #tpu.memory_space<vmem>>, vector<1x2048xf32>
    %c0_1 = arith.constant 0 : index
    %1 = memref.load %arg1[%c0_1] : memref<1xf32, #tpu.memory_space<smem>>
    %cst = arith.constant 5.000000e-01 : f32
    %2 = arith.mulf %1, %cst : f32
    %3 = vector.broadcast %2 : f32 to vector<1x2048xf32>
    %4 = arith.mulf %0, %3 : vector<1x2048xf32>
    %5 = math.tanh %4 : vector<1x2048xf32>
    %cst_2 = arith.constant 1.000000e+00 : f32
    %6 = vector.broadcast %cst_2 : f32 to vector<1x2048xf32>
    %7 = arith.addf %5, %6 : vector<1x2048xf32>
    %cst_3 = arith.constant 5.000000e-01 : f32
    %8 = vector.broadcast %cst_3 : f32 to vector<1x2048xf32>
    %9 = arith.mulf %8, %7 : vector<1x2048xf32>
    %10 = arith.mulf %0, %9 : vector<1x2048xf32>
    %c0_4 = arith.constant 0 : index
    %c0_5 = arith.constant 0 : index
    %11 = vector.load %arg3[%c0_4, %c0_5] : memref<1x2048xf32, #tpu.memory_space<vmem>>, vector<1x2048xf32>
    tpu.vector_store %arg3[%c0_4, %c0_5], %10 {strides = array<i32>} : memref<1x2048xf32, #tpu.memory_space<vmem>>, vector<1x2048xf32>,
    return
  }
  func.func @transform_0(%arg0: i32) -> i32 {
    %c0_i32 = arith.constant 0 : i32
    %c0_i32_0 = arith.constant 0 : i32
    return %c0_i32 : i32
  }
  func.func @transform_1(%arg0: i32) -> (i32, i32) {
    %c0_i32 = arith.constant 0 : i32
    %c0_i32_0 = arith.constant 0 : i32
    return %arg0, %c0_i32 : i32, i32
  }
  func.func @transform_2(%arg0: i32) -> (i32, i32) {
    %c0_i32 = arith.constant 0 : i32
    %c0_i32_0 = arith.constant 0 : i32
    return %arg0, %c0_i32 : i32, i32
  }
}

</mosaic_0001>

<bundles_post_ra>
// kernel: tpu_custom_call.1
= control target key start
LH: loop header
LB: loop body
LE: loop exit
PB: predicated region body
PF: predicated region fallthrough
CT: control target
= control target key end

     0   :  { %8 = vsyncpa [#allocation4], 0  ;;  %s155_s0 = inlined_call_operand.<no memory space> [shape: f32[1], index: 0, kind: input, shape index: {}]   ;;  %s156_s1 = inlined_call_operand.hbm [shape: f32[1,2048], index: 1, kind: input, shape index: {}]   ;;  %s157_s2 = inlined_call_operand.hbm [shape: f32[1,2048], index: 2, kind: output, shape index: {}]  }
   0x1   :  { %9 = vsyncpa [#allocation5], 0  ;;  %s111_s9 = smov [#allocation3]   ;;  %s63_s13 = scalar_lea.hbm %s156_s1, 256 }
   0x2   :  { %s18_s10 = sshll.u32 %s111_s9, 4  ;;  %p64_p0 = scmp.ne.s32.totalorder %s156_s1, %s63_s13  ;;  %s19_s10 = int_to_ptr.vmem [resolvable:$true] %s18_s10 }
   0x3   :  { %p67_p1 = scmp.lt.u32.totalorder %s63_s13, %s156_s1 }
   0x5   :  { %p69_p2 = pnand %p67_p1, %p64_p0 }
   0x7   :  { %72 = shalt.err (!%p69_p2)
}
   0x8   :  { %s73_s18 = scalar_lea.vmem %s19_s10, 256  ;;  %p78_p4 = scmp.lt.s32.totalorder %s19_s10, %s19_s10 }
   0x9   :  { %p74_p3 = scmp.ne.s32.totalorder %s19_s10, %s73_s18  ;;  %p79_p5 = scmp.lt.s32.totalorder %s73_s18, %s73_s18 }
   0xb   :  { %p80_p6 = por %p79_p5, %p78_p4 }
   0xd   :  { %p81_p7 = pnand %p80_p6, %p74_p3 }
   0xf   :  { %84 = shalt.err (!%p81_p7)
}
  0x10   :  { %21 = dma.hbm_to_vmem [thread:$0]  %s156_s1, 256, %s19_s10, [#allocation4]  }
  0x11   :  { %107 = dma.done.wait [#allocation4], 256  }
  0x12   :  { %108 = vsyncadd [#allocation4], 4294967040  ;;  %s28_s23 = smul.f32 0.5, %s155_s0  ;;  %v25_v1 = vld [vmem:[#allocation3] sm:$0xff]  ;;  %v26_v2 = vld [vmem:[#allocation3 + $0x8] sm:$0xff]  ;;  %s112_s24 = smov [#allocation6]  }
  0x13   :  { %s48_s1 = sshll.u32 %s112_s24, 4  ;;  %s49_s1 = int_to_ptr.vmem [resolvable:$true] %s48_s1 }
  0x14   :  { %v29_v0 = vstv %s28_s23  ;;  %s85_s0 = scalar_lea.vmem %s49_s1, 256  ;;  %p90_p9 = scmp.lt.s32.totalorder %s49_s1, %s49_s1 }
  0x15   :  { %v30_v3 = vmul.f32 %v29_v0, %v25_v1  ;;  %v31_v4 = vmul.f32 %v29_v0, %v26_v2  ;;  %p86_p8 = scmp.ne.s32.totalorder %s49_s1, %s85_s0  ;;  %p91_p10 = scmp.lt.s32.totalorder %s85_s0, %s85_s0 }
  0x17   :  { %59 = vtanh.f32 %v30_v3  ;;  %p92_p11 = por %p91_p10, %p90_p9 }
  0x18   :  { %61 = vtanh.f32 %v31_v4 }
  0x19   :  { %p93_p12 = pnand %p92_p11, %p86_p8 }
  0x21   :  { %v60_v5 = vpop.eup %59 }
  0x22   :  { %v62_v6 = vpop.eup %61  ;;  %v34_v7 = vadd.f32 1.0, %v60_v5 }
  0x23   :  { %v35_v8 = vadd.f32 1.0, %v62_v6 }
  0x24   :  { %v36_v9 = vmul.f32 0.5, %v34_v7 }
  0x25   :  { %v37_v10 = vmul.f32 0.5, %v35_v8 }
  0x26   :  { %v38_v11 = vmul.f32 %v36_v9, %v25_v1 }
  0x27   :  { %v39_v12 = vmul.f32 %v37_v10, %v26_v2 }
  0x28   :  { %40 = vst [vmem:[#allocation6] sm:$0xff] %v38_v11 }
  0x29   :  { %41 = vst [vmem:[#allocation6 + $0x8] sm:$0xff] %v39_v12 }
  0x2a   :  { %96 = shalt.err (!%p93_p12)
}
  0x2b   :  { %s97_s27 = scalar_lea.hbm %s157_s2, 256 }
  0x2c   :  { %p98_p13 = scmp.ne.s32.totalorder %s157_s2, %s97_s27  ;;  %p101_p0 = scmp.lt.u32.totalorder %s97_s27, %s157_s2 }
  0x2e   :  { %p103_p1 = pnand %p101_p0, %p98_p13 }
  0x30   :  { %106 = shalt.err (!%p103_p1)
}
  0x31   :  { %51 = dma.vmem_to_hbm [thread:$0]  %s49_s1, 256, %s157_s2, [#allocation5]  }
  0x32   :  { %109 = dma.done.wait [#allocation5], 256  }
  0x33   :  { %110 = vsyncadd [#allocation5], 4294967040 }
  0x34   :  { %55 = vsyncpa [#allocation4], 1 }
  0x35   :  { %56 = vsyncpa [#allocation5], 1 }

</bundles_post_ra>
